<compile_context>
chip_gen: v7x
topology: tpu7x:2x2x1
jax: 0.10.0
libtpu: 0.0.40
codegen_flags: <defaults>
</compile_context>

<pallas_src>
import math
from functools import partial

import jax
import jax.numpy as jnp
from jax import lax
from jax.experimental import pallas as pl
from jax.experimental.pallas import tpu as pltpu

_INV_SQRT2 = 1.0 / math.sqrt(2.0)
_BN_EPS = 1e-3
_LANE = 128
_SUBLANE = 8


def _round_up(x, m):
    return (x + m - 1) // m * m


# ---------------------------------------------------------------------------
# Kernels
# ---------------------------------------------------------------------------
def _gelu_exact(y):
    return 0.5 * y * (1.0 + lax.erf(y * _INV_SQRT2))


def _conv_stats_kernel(p_ref, w_ref, sum_ref, sumsq_ref):
    """Pass 1 (recompute path): conv tile + per-channel partial sum / sum-sq."""
    conv = jnp.dot(p_ref[...], w_ref[...], preferred_element_type=jnp.float32)  # (TM, Cp)
    s = jnp.sum(conv, axis=0, keepdims=True)                                    # VALU/XLU
    sq = jnp.sum(conv * conv, axis=0, keepdims=True)
    sum_ref[...] = jnp.broadcast_to(s, sum_ref.shape)
    sumsq_ref[...] = jnp.broadcast_to(sq, sumsq_ref.shape)


def _conv_stats_cache_kernel(p_ref, w_ref, conv_ref, sum_ref, sumsq_ref):
    """Pass 1 (cached path): conv tile, cache it to HBM as bf16, emit stats."""
    conv = jnp.dot(p_ref[...], w_ref[...], preferred_element_type=jnp.float32)  # (TM, Cp)
    conv_ref[...] = conv.astype(conv_ref.dtype)
    s = jnp.sum(conv, axis=0, keepdims=True)
    sq = jnp.sum(conv * conv, axis=0, keepdims=True)
    sum_ref[...] = jnp.broadcast_to(s, sum_ref.shape)
    sumsq_ref[...] = jnp.broadcast_to(sq, sumsq_ref.shape)


def _conv_bn_gelu_kernel(p_ref, w_ref, a_ref, b_ref, o_ref):
    """Pass 2 (recompute path): conv again + folded BN (one FMA) + exact GELU."""
    conv = jnp.dot(p_ref[...], w_ref[...], preferred_element_type=jnp.float32)
    y = conv * a_ref[...] + b_ref[...]
    o_ref[...] = _gelu_exact(y).astype(o_ref.dtype)


def _bn_gelu_kernel(conv_ref, a_ref, b_ref, o_ref):
    """Pass 2 (cached path): pure elementwise BN FMA + exact GELU."""
    y = conv_ref[...].astype(jnp.float32) * a_ref[...] + b_ref[...]
    o_ref[...] = _gelu_exact(y).astype(o_ref.dtype)


# ---------------------------------------------------------------------------
# Wrapper-side helpers
# ---------------------------------------------------------------------------
def _im2col_nchw_bf16(x, kh, kw, stride, padding):
    """x: (N, C, H, W) -> bf16 patches (N*Ho*Wo, C*kh*kw), K ordered (C, kh, kw)."""
    n, c, h, w = x.shape
    ho = (h + 2 * padding - kh) // stride + 1
    wo = (w + 2 * padding - kw) // stride + 1
    x = x.astype(jnp.bfloat16)                       # cast BEFORE inflation: half the bytes
    if kh == 1 and kw == 1 and padding == 0:         # 1x1 fast path: no im2col
        p = x[:, :, ::stride, ::stride].transpose(0, 2, 3, 1)
        return p.reshape(n * ho * wo, c), ho, wo
    xp = jnp.pad(x, ((0, 0), (0, 0), (padding, padding), (padding, padding)))
    slabs = []
    for i in range(kh):
        for j in range(kw):
            slabs.append(xp[:, :, i:i + stride * ho:stride, j:j + stride * wo:stride])
    p = jnp.stack(slabs, axis=0).reshape(kh, kw, n, c, ho, wo)
    p = p.transpose(2, 4, 5, 3, 0, 1)                # (N, Ho, Wo, C, kh, kw)
    return p.reshape(n * ho * wo, c * kh * kw), ho, wo


def _vmem_capacity_bytes():
    try:
        return int(pltpu.get_tpu_info().vmem_capacity_bytes)
    except Exception:
        return 64 << 20                              # worst case: v7x per-TC VMEM


def _plan_tiles(m_true, k_pad, c_pad, cache_conv, budget):
    """Pick TM; budget pipeline buffers AND in-kernel f32 temporaries."""
    # Per-M-row VMEM bytes (double-buffered DMA tiles + f32 temps per pass).
    bpr_p1 = 2 * k_pad * 2 + 3 * c_pad * 4 + (2 * c_pad * 2 if cache_conv else 0)
    bpr_p2 = (2 * c_pad * 2 if cache_conv else 2 * k_pad * 2) + 2 * c_pad * 4 + 3 * c_pad * 4
    per_row = max(bpr_p1, bpr_p2)
    # Resident weight (counted double-buffered, to be safe) + tiny stats / a,b blocks.
    fixed = 2 * k_pad * c_pad * 2 + 4 * _SUBLANE * c_pad * 4 + 4 * c_pad * 4
    tm = max((budget - fixed) // per_row, 16)
    tm = min(tm, 1024, _round_up(m_true, 16))
    # Keep >= 4 grid steps when M allows (>=2 tiles per TensorCore on v7x, and
    # real DMA/compute pipelining) without shrinking tiles below 128 rows.
    cap = ((m_true + 3) // 4 // _LANE) * _LANE
    if cap >= _LANE:
        tm = min(tm, cap)
    if tm >= _LANE:
        tm = (tm // _LANE) * _LANE
    else:
        tm = max(16, (tm // 16) * 16)                # bf16 natural sublane tile is 16
    m_pad = _round_up(m_true, tm)
    n_tiles = m_pad // tm
    vmem_need = tm * per_row + fixed
    return int(tm), int(m_pad), int(n_tiles), int(vmem_need)


@partial(jax.jit, static_argnames=("stride", "padding"))
def basic_conv2d(x, conv_weight, bn_gamma, bn_beta, *, stride, padding):
    """x: (N, C_in, H, W) NCHW f32. conv_weight: (C_out, C_in, kh, kw). Returns NCHW f32."""
    n = x.shape[0]
    c_out, c_in, kh, kw = conv_weight.shape

    patches, ho, wo = _im2col_nchw_bf16(x, kh, kw, stride, padding)     # (M, K) bf16
    m_true, k = patches.shape

    # K padding policy: pad to 128 only if overhead < ~10%; otherwise just round
    # to the bf16 sublane pack (16) and let the MXU pad the contraction internally.
    k_lane = _round_up(k, _LANE)
    k_pad = k_lane if k_lane <= int(1.1 * k) else _round_up(k, 16)
    c_pad = _round_up(c_out, _LANE)                  # lane-dense MXU output / stores

    # Cache the conv between passes when re-reading the patches would cost more
    # HBM traffic than writing + reading a bf16 conv tile (i.e. K > 2 * C_pad).
    cache_conv = (kh * kw > 1) and (k_pad > 2 * c_pad)

    cap = _vmem_capacity_bytes()
    budget = min(int(0.6 * cap), 96 << 20)
    tm, m_pad, n_tiles, vmem_need = _plan_tiles(m_true, k_pad, c_pad, cache_conv, budget)
    vmem_limit = int(min(max(int(1.4 * vmem_need), 32 << 20), int(0.85 * cap)))

    cparams = pltpu.CompilerParams(
        dimension_semantics=("parallel",),           # independent M tiles -> both TCs on v7x
        vmem_limit_bytes=vmem_limit)

    # Pad operands (bf16 for the MXU; f32 accumulation happens in-kernel).
    patches_p = jnp.pad(patches, ((0, m_pad - m_true), (0, k_pad - k)))
    w_mat = conv_weight.reshape(c_out, c_in * kh * kw).T                 # (K, C_out)
    w_p = jnp.pad(w_mat, ((0, k_pad - k), (0, c_pad - c_out))).astype(jnp.bfloat16)
    gamma_p = jnp.pad(bn_gamma.astype(jnp.float32), (0, c_pad - c_out))
    beta_p = jnp.pad(bn_beta.astype(jnp.float32), (0, c_pad - c_out))

    patch_spec = pl.BlockSpec((tm, k_pad), lambda i: (i, 0))
    weight_spec = pl.BlockSpec((k_pad, c_pad), lambda i: (0, 0))         # stays resident
    stats_spec = pl.BlockSpec((_SUBLANE, c_pad), lambda i: (i, 0))
    stats_shape = jax.ShapeDtypeStruct((n_tiles * _SUBLANE, c_pad), jnp.float32)
    conv_tile_spec = pl.BlockSpec((tm, c_pad), lambda i: (i, 0))
    ab_spec = pl.BlockSpec((1, c_pad), lambda i: (0, 0))

    # ---- pass 1: conv + per-channel partial sum / sum-of-squares (+ bf16 conv cache) ----
    if cache_conv:
        conv_cache, part_sum, part_sq = pl.pallas_call(
            _conv_stats_cache_kernel,
            grid=(n_tiles,),
            in_specs=[patch_spec, weight_spec],
            out_specs=[conv_tile_spec, stats_spec, stats_spec],
            out_shape=[jax.ShapeDtypeStruct((m_pad, c_pad), jnp.bfloat16),
                       stats_shape, stats_shape],
            compiler_params=cparams,
        )(patches_p, w_p)
    else:
        part_sum, part_sq = pl.pallas_call(
            _conv_stats_kernel,
            grid=(n_tiles,),
            in_specs=[patch_spec, weight_spec],
            out_specs=[stats_spec, stats_spec],
            out_shape=[stats_shape, stats_shape],
            compiler_params=cparams,
        )(patches_p, w_p)

    # ---- finalize training-mode BN stats (biased var) and fold into one FMA ----
    inv_m = 1.0 / float(m_true)                      # zero-padded rows contribute 0
    total_sum = part_sum.reshape(n_tiles, _SUBLANE, c_pad)[:, 0, :].sum(axis=0)
    total_sq = part_sq.reshape(n_tiles, _SUBLANE, c_pad)[:, 0, :].sum(axis=0)
    mean = total_sum * inv_m
    var = jnp.maximum(total_sq * inv_m - mean * mean, 0.0)
    a = (gamma_p * lax.rsqrt(var + _BN_EPS)).reshape(1, c_pad)
    b = (beta_p - mean * a[0]).reshape(1, c_pad)

    # ---- pass 2: BN FMA + exact GELU (elementwise over cached conv, or conv recompute) ----
    out_spec = pl.BlockSpec((tm, c_pad), lambda i: (i, 0))
    out_shape = jax.ShapeDtypeStruct((m_pad, c_pad), jnp.float32)
    if cache_conv:
        out_flat = pl.pallas_call(
            _bn_gelu_kernel,
            grid=(n_tiles,),
            in_specs=[conv_tile_spec, ab_spec, ab_spec],
            out_specs=out_spec,
            out_shape=out_shape,
            compiler_params=cparams,
        )(conv_cache, a, b)
    else:
        out_flat = pl.pallas_call(
            _conv_bn_gelu_kernel,
            grid=(n_tiles,),
            in_specs=[patch_spec, weight_spec, ab_spec, ab_spec],
            out_specs=out_spec,
            out_shape=out_shape,
            compiler_params=cparams,
        )(patches_p, w_p, a, b)

    out = out_flat[:m_true, :c_out].reshape(n, ho, wo, c_out).transpose(0, 3, 1, 2)
    return out


def _reference(x, conv_weight, bn_gamma, bn_beta, *, stride, padding):
    """Plain-JAX reference mirroring the PyTorch forward (training BN, exact GELU)."""
    y = lax.conv_general_dilated(
        x, conv_weight, window_strides=(stride, stride),
        padding=[(padding, padding), (padding, padding)],
        dimension_numbers=("NCHW", "OIHW", "NCHW"))
    mean = jnp.mean(y, axis=(0, 2, 3), keepdims=True)
    var = jnp.mean((y - mean) ** 2, axis=(0, 2, 3), keepdims=True)
    xhat = (y - mean) / jnp.sqrt(var + _BN_EPS)
    yb = xhat * bn_gamma.reshape(1, -1, 1, 1) + bn_beta.reshape(1, -1, 1, 1)
    return 0.5 * yb * (1.0 + lax.erf(yb * _INV_SQRT2))


def _make_params(key, c_out, c_in, kh, kw):
    fan_in = c_in * kh * kw
    bound = 1.0 / math.sqrt(fan_in)
    w = jax.random.uniform(key, (c_out, c_in, kh, kw), dtype=jnp.float32,
                           minval=-bound, maxval=bound)
    gamma = jnp.ones((c_out,), dtype=jnp.float32)
    beta = jnp.zeros((c_out,), dtype=jnp.float32)
    return w, gamma, beta


if __name__ == "__main__":
    key = jax.random.PRNGKey(0)
    k_x1, k_w1, k_x2, k_w2 = jax.random.split(key, 4)

    # --- case 1 (recompute path): BasicConv2d(4, 8, kernel=3, stride=1, padding=1) ---
    N, C_IN, H, W = 2, 4, 16, 16
    C_OUT, KH, KW = 8, 3, 3
    STRIDE, PAD = 1, 1
    x = jax.random.normal(k_x1, (N, C_IN, H, W), dtype=jnp.float32)
    conv_w, bn_g, bn_b = _make_params(k_w1, C_OUT, C_IN, KH, KW)

    out = basic_conv2d(x, conv_w, bn_g, bn_b, stride=STRIDE, padding=PAD)
    out = jax.block_until_ready(out)
    assert out.shape == (N, C_OUT, H, W), out.shape

    # Tight check: reference fed the same bf16-quantized MXU operands (f32 accumulate).
    xq = x.astype(jnp.bfloat16).astype(jnp.float32)
    wq = conv_w.astype(jnp.bfloat16).astype(jnp.float32)
    ref_q = _reference(xq, wq, bn_g, bn_b, stride=STRIDE, padding=PAD)
    assert jnp.allclose(out, ref_q, rtol=1e-3, atol=1e-3), float(jnp.max(jnp.abs(out - ref_q)))

    # Loose sanity check vs. the pure-f32 module (only bf16 operand quantization differs).
    ref_f = _reference(x, conv_w, bn_g, bn_b, stride=STRIDE, padding=PAD)
    assert jnp.allclose(out, ref_f, rtol=5e-2, atol=5e-2), float(jnp.max(jnp.abs(out - ref_f)))

    # --- case 2 (cached-conv path: K = 32*9 = 288 > 2*c_pad): BasicConv2d(32, 8, 3, 1, 1) ---
    N2, C_IN2, H2, W2 = 2, 32, 8, 8
    x2 = jax.random.normal(k_x2, (N2, C_IN2, H2, W2), dtype=jnp.float32)
    conv_w2, bn_g2, bn_b2 = _make_params(k_w2, C_OUT, C_IN2, KH, KW)

    out2 = basic_conv2d(x2, conv_w2, bn_g2, bn_b2, stride=STRIDE, padding=PAD)
    out2 = jax.block_until_ready(out2)
    assert out2.shape == (N2, C_OUT, H2, W2), out2.shape

    xq2 = x2.astype(jnp.bfloat16).astype(jnp.float32)
    wq2 = conv_w2.astype(jnp.bfloat16).astype(jnp.float32)
    ref_q2 = _reference(xq2, wq2, bn_g2, bn_b2, stride=STRIDE, padding=PAD)
    # Slightly looser: the cached path also rounds the conv activations to bf16.
    assert jnp.allclose(out2, ref_q2, rtol=2e-2, atol=2e-2), float(jnp.max(jnp.abs(out2 - ref_q2)))

    print("KERNEL_OK")
</pallas_src>

<mosaic_0001>
module attributes {stable_mosaic.version = 11 : i64} {
  func.func @_conv_stats_kernel(%arg0: i32, %arg1: memref<128x48xbf16, #tpu.memory_space<vmem>>, %arg2: memref<48x128xbf16, #tpu.memory_space<vmem>>, %arg3: memref<8x128xf32, #tpu.memory_space<vmem>>, %arg4: memref<8x128xf32, #tpu.memory_space<vmem>>) attributes {dimension_semantics = [#tpu.dimension_semantics<parallel>], iteration_bounds = array<i64: 4>, scalar_prefetch = 0 : i64, scratch_operands = 0 : i64, tpu.core_type = #tpu.core_type<tc>, window_params = [{transform_indices = @transform_0, window_bounds = array<i64: 128, 48>}, {pipeline_mode = #tpu.pipeline_mode<synchronous>, transform_indices = @transform_1, window_bounds = array<i64: 48, 128>}, {transform_indices = @transform_2, window_bounds = array<i64: 8, 128>}, {transform_indices = @transform_3, window_bounds = array<i64: 8, 128>}]} {
    %c0 = arith.constant 0 : index
    %c0_0 = arith.constant 0 : index
    %0 = vector.load %arg1[%c0, %c0_0] : memref<128x48xbf16, #tpu.memory_space<vmem>>, vector<128x48xbf16>
    %c0_1 = arith.constant 0 : index
    %c0_2 = arith.constant 0 : index
    %1 = vector.load %arg2[%c0_1, %c0_2] : memref<48x128xbf16, #tpu.memory_space<vmem>>, vector<48x128xbf16>
    %cst = arith.constant dense<0.000000e+00> : vector<128x128xf32>
    %2 = tpu.matmul %0, %1, %cst {dimension_numbers = #tpu.dot_dimension_numbers<[1], [0], [0], [1], [0, 0, 1, 1], [], []>} : vector<128x48xbf16>, vector<48x128xbf16>, vector<128x128xf32> -> vector<128x128xf32>
    %cst_3 = arith.constant dense<0.000000e+00> : vector<128xf32>
    %3 = vector.multi_reduction <add>, %2, %cst_3 [0] : vector<128x128xf32> to vector<128xf32>
    %4 = vector.shape_cast %3 : vector<128xf32> to vector<1x128xf32>
    %5 = arith.mulf %2, %2 : vector<128x128xf32>
    %cst_4 = arith.constant dense<0.000000e+00> : vector<128xf32>
    %6 = vector.multi_reduction <add>, %5, %cst_4 [0] : vector<128x128xf32> to vector<128xf32>
    %7 = vector.shape_cast %6 : vector<128xf32> to vector<1x128xf32>
    %8 = vector.shape_cast %4 : vector<1x128xf32> to vector<1x128xf32>
    %9 = vector.broadcast %8 : vector<1x128xf32> to vector<8x128xf32>
    %c0_5 = arith.constant 0 : index
    %c0_6 = arith.constant 0 : index
    %10 = vector.load %arg3[%c0_5, %c0_6] : memref<8x128xf32, #tpu.memory_space<vmem>>, vector<8x128xf32>
    tpu.vector_store %arg3[%c0_5, %c0_6], %9 {strides = array<i32>} : memref<8x128xf32, #tpu.memory_space<vmem>>, vector<8x128xf32>,
    %11 = vector.shape_cast %7 : vector<1x128xf32> to vector<1x128xf32>
    %12 = vector.broadcast %11 : vector<1x128xf32> to vector<8x128xf32>
    %c0_7 = arith.constant 0 : index
    %c0_8 = arith.constant 0 : index
    %13 = vector.load %arg4[%c0_7, %c0_8] : memref<8x128xf32, #tpu.memory_space<vmem>>, vector<8x128xf32>
    tpu.vector_store %arg4[%c0_7, %c0_8], %12 {strides = array<i32>} : memref<8x128xf32, #tpu.memory_space<vmem>>, vector<8x128xf32>,
    return
  }
  func.func @transform_0(%arg0: i32) -> (i32, i32) {
    %c0_i32 = arith.constant 0 : i32
    %c0_i32_0 = arith.constant 0 : i32
    return %arg0, %c0_i32 : i32, i32
  }
  func.func @transform_1(%arg0: i32) -> (i32, i32) {
    %c0_i32 = arith.constant 0 : i32
    %c0_i32_0 = arith.constant 0 : i32
    %c0_i32_1 = arith.constant 0 : i32
    return %c0_i32, %c0_i32_0 : i32, i32
  }
  func.func @transform_2(%arg0: i32) -> (i32, i32) {
    %c0_i32 = arith.constant 0 : i32
    %c0_i32_0 = arith.constant 0 : i32
    return %arg0, %c0_i32 : i32, i32
  }
  func.func @transform_3(%arg0: i32) -> (i32, i32) {
    %c0_i32 = arith.constant 0 : i32
    %c0_i32_0 = arith.constant 0 : i32
    return %arg0, %c0_i32 : i32, i32
  }
}

module attributes {stable_mosaic.version = 11 : i64} {
  func.func @_conv_bn_gelu_kernel(%arg0: i32, %arg1: memref<128x48xbf16, #tpu.memory_space<vmem>>, %arg2: memref<48x128xbf16, #tpu.memory_space<vmem>>, %arg3: memref<1x128xf32, #tpu.memory_space<vmem>>, %arg4: memref<1x128xf32, #tpu.memory_space<vmem>>, %arg5: memref<128x128xf32, #tpu.memory_space<vmem>>) attributes {dimension_semantics = [#tpu.dimension_semantics<parallel>], iteration_bounds = array<i64: 4>, scalar_prefetch = 0 : i64, scratch_operands = 0 : i64, tpu.core_type = #tpu.core_type<tc>, window_params = [{transform_indices = @transform_0, window_bounds = array<i64: 128, 48>}, {pipeline_mode = #tpu.pipeline_mode<synchronous>, transform_indices = @transform_1, window_bounds = array<i64: 48, 128>}, {pipeline_mode = #tpu.pipeline_mode<synchronous>, transform_indices = @transform_2, window_bounds = array<i64: 1, 128>}, {pipeline_mode = #tpu.pipeline_mode<synchronous>, transform_indices = @transform_3, window_bounds = array<i64: 1, 128>}, {transform_indices = @transform_4, window_bounds = array<i64: 128, 128>}]} {
    %c0 = arith.constant 0 : index
    %c0_0 = arith.constant 0 : index
    %0 = vector.load %arg1[%c0, %c0_0] : memref<128x48xbf16, #tpu.memory_space<vmem>>, vector<128x48xbf16>
    %c0_1 = arith.constant 0 : index
    %c0_2 = arith.constant 0 : index
    %1 = vector.load %arg2[%c0_1, %c0_2] : memref<48x128xbf16, #tpu.memory_space<vmem>>, vector<48x128xbf16>
    %cst = arith.constant dense<0.000000e+00> : vector<128x128xf32>
    %2 = tpu.matmul %0, %1, %cst {dimension_numbers = #tpu.dot_dimension_numbers<[1], [0], [0], [1], [0, 0, 1, 1], [], []>} : vector<128x48xbf16>, vector<48x128xbf16>, vector<128x128xf32> -> vector<128x128xf32>
    %c0_3 = arith.constant 0 : index
    %c0_4 = arith.constant 0 : index
    %3 = vector.load %arg3[%c0_3, %c0_4] : memref<1x128xf32, #tpu.memory_space<vmem>>, vector<1x128xf32>
    %4 = vector.broadcast %3 : vector<1x128xf32> to vector<128x128xf32>
    %5 = arith.mulf %2, %4 : vector<128x128xf32>
    %c0_5 = arith.constant 0 : index
    %c0_6 = arith.constant 0 : index
    %6 = vector.load %arg4[%c0_5, %c0_6] : memref<1x128xf32, #tpu.memory_space<vmem>>, vector<1x128xf32>
    %7 = vector.broadcast %6 : vector<1x128xf32> to vector<128x128xf32>
    %8 = arith.addf %5, %7 : vector<128x128xf32>
    %cst_7 = arith.constant 5.000000e-01 : f32
    %9 = vector.broadcast %cst_7 : f32 to vector<128x128xf32>
    %10 = arith.mulf %9, %8 : vector<128x128xf32>
    %cst_8 = arith.constant 0.707106769 : f32
    %11 = vector.broadcast %cst_8 : f32 to vector<128x128xf32>
    %12 = arith.mulf %8, %11 : vector<128x128xf32>
    %13 = math.erf %12 : vector<128x128xf32>
    %cst_9 = arith.constant 1.000000e+00 : f32
    %14 = vector.broadcast %cst_9 : f32 to vector<128x128xf32>
    %15 = arith.addf %14, %13 : vector<128x128xf32>
    %16 = arith.mulf %10, %15 : vector<128x128xf32>
    %c0_10 = arith.constant 0 : index
    %c0_11 = arith.constant 0 : index
    %17 = vector.load %arg5[%c0_10, %c0_11] : memref<128x128xf32, #tpu.memory_space<vmem>>, vector<128x128xf32>
    tpu.vector_store %arg5[%c0_10, %c0_11], %16 {strides = array<i32>} : memref<128x128xf32, #tpu.memory_space<vmem>>, vector<128x128xf32>,
    return
  }
  func.func @transform_0(%arg0: i32) -> (i32, i32) {
    %c0_i32 = arith.constant 0 : i32
    %c0_i32_0 = arith.constant 0 : i32
    return %arg0, %c0_i32 : i32, i32
  }
  func.func @transform_1(%arg0: i32) -> (i32, i32) {
    %c0_i32 = arith.constant 0 : i32
    %c0_i32_0 = arith.constant 0 : i32
    %c0_i32_1 = arith.constant 0 : i32
    return %c0_i32, %c0_i32_0 : i32, i32
  }
  func.func @transform_2(%arg0: i32) -> (i32, i32) {
    %c0_i32 = arith.constant 0 : i32
    %c0_i32_0 = arith.constant 0 : i32
    %c0_i32_1 = arith.constant 0 : i32
    return %c0_i32, %c0_i32_0 : i32, i32
  }
  func.func @transform_3(%arg0: i32) -> (i32, i32) {
    %c0_i32 = arith.constant 0 : i32
    %c0_i32_0 = arith.constant 0 : i32
    %c0_i32_1 = arith.constant 0 : i32
    return %c0_i32, %c0_i32_0 : i32, i32
  }
  func.func @transform_4(%arg0: i32) -> (i32, i32) {
    %c0_i32 = arith.constant 0 : i32
    %c0_i32_0 = arith.constant 0 : i32
    return %arg0, %c0_i32 : i32, i32
  }
}

</mosaic_0001>

<bundles_post_ra>
// kernel: basic_conv2d.2
= control target key start
LH: loop header
LB: loop body
LE: loop exit
PB: predicated region body
PF: predicated region fallthrough
CT: control target
= control target key end

     0   :  { %s645_s12 = smov 0   ;;  %s687_s0 = inlined_call_operand.vmem [shape: bf16[512,48], index: 0, kind: input, shape index: {}]   ;;  %s688_s1 = inlined_call_operand.vmem [shape: bf16[48,128], index: 1, kind: input, shape index: {}]   ;;  %s689_s2 = inlined_call_operand.vmem [shape: f32[32,128], index: 2, kind: output, shape index: {0}]   ;;  %s690_s3 = inlined_call_operand.vmem [shape: f32[32,128], index: 3, kind: output, shape index: {1}]  }
   0x1 LB: > { %s651_s13 = sadd.s32 4294967295, %s623_s12   ;;  %p533_p0 = scmp.ge.s32.totalorder %s623_s12, 1  ;;  %s623_s12 = sphi %s645_s12, %s14_s12  }
   0x2   : > { %p141_p1 = scmp.lt.s32.totalorder %s623_s12, 5 }
   0x4   : > { %p142_p2 = pnand %p533_p0, %p141_p1 }
   0x5   : > { %v606_v0 = vld [vmem:[%s688_s1] sm:$0xff] (!%p142_p2)   ;;  %s534_s16 = sshll.u32 (!%p142_p2), %s651_s13, 4  ;;  %v607_v1 = vld [vmem:[%s688_s1 + $0x8] sm:$0xff] (!%p142_p2)   ;;  %v608_v2 = vld [vmem:[%s688_s1 + $0x10] sm:$0xff] (!%p142_p2)   ;;  %vm263_vm0 = vcmask (!%p142_p2), 392192   ;;  %p174_p4 = scmp.lt.s32.totalorder (!%p142_p2), %s651_s13, 3 }
   0x6   : > { %145 = sbr.rel (%p142_p2) target bundleno = 278 (0x116), region = 28  ;;  %p169_p3 = scmp.lt.s32.totalorder (!%p142_p2), %s534_s16, 63  ;;  %570 = vmatprep.subr.bf16.mxu0 (!%p142_p2), %v606_v0  ;;  %592 = vmatprep.subr.bf16.mxu1 (!%p142_p2), %v606_v0 }
   0x7   : > { %571 = vmatpush3.bf16.msra.mxu0 (!%p142_p2), %v606_v0  ;;  %595 = vmatpush3.bf16.msra.mxu1 (!%p142_p2), %v606_v0 }
   0x8   : > { %572 = vmatprep.subr.bf16.mxu0 (!%p142_p2), %v607_v1  ;;  %593 = vmatprep.subr.bf16.mxu1 (!%p142_p2), %v607_v1 }
   0xb   : > { %573 = vmatpush3.bf16.msra.mxu0 (!%p142_p2), %v607_v1  ;;  %596 = vmatpush3.bf16.msra.mxu1 (!%p142_p2), %v607_v1 }
   0xc   : > { %574 = vmatprep.subr.bf16.mxu0 (!%p142_p2), %v608_v2  ;;  %594 = vmatprep.subr.bf16.mxu1 (!%p142_p2), %v608_v2 }
   0xd   : > { %s692_s16 = smov (!%p169_p3, %s534_s16), 63  ;;  %s694_s13 = smov (!%p174_p4, %s651_s13), 3 }
   0xe   : > { %s535_s21 = sshll.u32 %s692_s16, 2  ;;  %s536_s25 = sshll.u32 %s694_s13, 3 }
   0xf   : > { %s172_s24 = scalar_lea.vmem %s687_s0, %s535_s21  ;;  %575 = vmatpush3.bf16.msra.mxu0 %v608_v2  ;;  %597 = vmatpush3.bf16.msra.mxu1 %v608_v2  ;;  %s177_s28 = scalar_lea.vmem %s689_s2, %s536_s25 }
  0x10   : > { %v609_v3 = vld [vmem:[%s172_s24] sm:$0xff]   ;;  %v610_v4 = vld [vmem:[%s172_s24 + $0x8] sm:$0xff]   ;;  %v611_v5 = vld [vmem:[%s172_s24 + $0x10] sm:$0xff]   ;;  %s181_s4 = scalar_lea.vmem %s690_s3, %s536_s25 }
  0x11   : > { %576 = vmatprep.mubr.msk.bf16.mxu0 %vm263_vm0, %v609_v3  ;;  %v613_v6 = vld [vmem:[%s172_s24 + $0x20] sm:$0xff]   ;;  %v614_v7 = vld [vmem:[%s172_s24 + $0x28] sm:$0xff]   ;;  %v615_v8 = vld [vmem:[%s172_s24 + $0x30] sm:$0xff]  }
  0x12   : > { %584 = vmatprep.mubr.msk.bf16.mxu1 %vm263_vm0, %v613_v6  ;;  %577 = vmatmul.mubr.msk.bf16.vlgmr.msra.gmra.mrb[0].mxu0 %vm263_vm0, %v610_v4  ;;  %v612_v9 = vld [vmem:[%s172_s24 + $0x18] sm:$0xff]  }
  0x13   : > { %585 = vmatmul.mubr.msk.bf16.vlgmr.msra.gmra.mrb[0].mxu1 %vm263_vm0, %v614_v7  ;;  %580 = vmatprep.mubr.msk.bf16.mxu0 %vm263_vm0, %v611_v5  ;;  %v616_v10 = vld [vmem:[%s172_s24 + $0x38] sm:$0xff]  }
  0x14   : > { %588 = vmatprep.mubr.msk.bf16.mxu1 %vm263_vm0, %v615_v8 }
  0x1a   : > { %581 = vmatmul.mubr.msk.bf16.gmra.mrb[4].mxu0 %vm263_vm0, %v612_v9 }
  0x1b   : > { %589 = vmatmul.mubr.msk.bf16.gmra.mrb[4].mxu1 %vm263_vm0, %v616_v10 }
  0xe5   : > { %v578_v11 = vpop.f32.mrb[0].mxu0 }
  0xe6   : > { %v586_v12 = vpop.f32.mrb[0].mxu1  ;;  %v322_v13 = vpop.f32.mrb[1].mxu0  ;;  %v408_v22 = vmul.f32 %v578_v11, %v578_v11 }
  0xe7   : > { %v354_v14 = vpop.f32.mrb[1].mxu1  ;;  %v579_v15 = vpop.f32.mrb[2].mxu0  ;;  %v406_v19 = vmul.f32 %v322_v13, %v322_v13  ;;  %v416_v54 = vmul.f32 %v586_v12, %v586_v12 }
  0xe8   : > { %v587_v16 = vpop.f32.mrb[2].mxu1  ;;  %v325_v17 = vpop.f32.mrb[3].mxu0  ;;  %v409_v25 = vmul.f32 %v579_v15, %v579_v15  ;;  %v414_v48 = vmul.f32 %v354_v14, %v354_v14 }
  0xe9   : > { %v357_v18 = vpop.f32.mrb[3].mxu1  ;;  %v385_v20 = vadd.f32 %v325_v17, %v322_v13  ;;  %v407_v21 = vmul.f32 %v325_v17, %v325_v17  ;;  %v417_v57 = vmul.f32 %v587_v16, %v587_v16 }
  0xea   : > { %v415_v53 = vmul.f32 %v357_v18, %v357_v18 }
  0xeb   : > { %v386_v23 = vadd.f32 %v578_v11, %v385_v20  ;;  %v422_v24 = vadd.f32 %v407_v21, %v406_v19 }
  0xed   : > { %v423_v26 = vadd.f32 %v422_v24, %v408_v22  ;;  %v582_v27 = vpop.f32.mrb[4].mxu0  ;;  %v387_v28 = vadd.f32 %v579_v15, %v386_v23 }
  0xee   : > { %v590_v29 = vpop.f32.mrb[4].mxu1  ;;  %v338_v30 = vpop.f32.mrb[5].mxu0  ;;  %v412_v42 = vmul.f32 %v582_v27, %v582_v27 }
  0xef   : > { %v370_v31 = vpop.f32.mrb[5].mxu1  ;;  %v388_v32 = vadd.f32 %v387_v28, %v338_v30  ;;  %v410_v33 = vmul.f32 %v338_v30, %v338_v30  ;;  %v424_v34 = vadd.f32 %v423_v26, %v409_v25  ;;  %v583_v35 = vpop.f32.mrb[6].mxu0  ;;  %v420_v2 = vmul.f32 %v590_v29, %v590_v29 }
  0xf0   : > { %v591_v36 = vpop.f32.mrb[6].mxu1  ;;  %v341_v37 = vpop.f32.mrb[7].mxu0  ;;  %v413_v45 = vmul.f32 %v583_v35, %v583_v35  ;;  %v418_v60 = vmul.f32 %v370_v31, %v370_v31 }
  0xf1   : > { %v373_v38 = vpop.f32.mrb[7].mxu1  ;;  %v425_v39 = vadd.f32 %v424_v34, %v410_v33  ;;  %v389_v40 = vadd.f32 %v388_v32, %v341_v37  ;;  %v411_v41 = vmul.f32 %v341_v37, %v341_v37  ;;  %v421_v5 = vmul.f32 %v591_v36, %v591_v36 }
  0xf2   : > { %v419_v1 = vmul.f32 %v373_v38, %v373_v38 }
  0xf3   : > { %v390_v43 = vadd.f32 %v582_v27, %v389_v40  ;;  %v426_v44 = vadd.f32 %v425_v39, %v411_v41 }
  0xf5   : > { %v427_v46 = vadd.f32 %v426_v44, %v412_v42  ;;  %v391_v47 = vadd.f32 %v583_v35, %v390_v43 }
  0xf7   : > { %v392_v49 = vadd.f32 %v391_v47, %v354_v14  ;;  %v428_v50 = vadd.f32 %v427_v46, %v413_v45 }
  0xf9   : > { %v429_v51 = vadd.f32 %v428_v50, %v414_v48  ;;  %v393_v52 = vadd.f32 %v392_v49, %v357_v18 }
  0xfb   : > { %v394_v55 = vadd.f32 %v586_v12, %v393_v52  ;;  %v430_v56 = vadd.f32 %v429_v51, %v415_v53 }
  0xfd   : > { %v431_v58 = vadd.f32 %v430_v56, %v416_v54  ;;  %v395_v59 = vadd.f32 %v587_v16, %v394_v55 }
  0xff   : > { %v396_v61 = vadd.f32 %v395_v59, %v370_v31  ;;  %v432_v62 = vadd.f32 %v431_v58, %v417_v57 }
 0x101   : > { %v433_v63 = vadd.f32 %v432_v62, %v418_v60  ;;  %v397_v0 = vadd.f32 %v396_v61, %v373_v38 }
 0x103   : > { %v398_v3 = vadd.f32 %v590_v29, %v397_v0  ;;  %v434_v4 = vadd.f32 %v433_v63, %v419_v1 }
 0x105   : > { %v399_v6 = vadd.f32 %v591_v36, %v398_v3  ;;  %v435_v7 = vadd.f32 %v434_v4, %v420_v2 }
 0x107   : > { %v400_v8 = vrot.slane %v399_v6, 4  ;;  %v436_v9 = vadd.f32 %v435_v7, %v421_v5 }
 0x109   : > { %v401_v10 = vadd.f32 %v400_v8, %v399_v6  ;;  %v437_v11 = vrot.slane %v436_v9, 4 }
 0x10b   : > { %v402_v12 = vrot.slane %v401_v10, 2  ;;  %v438_v13 = vadd.f32 %v437_v11, %v436_v9 }
 0x10d   : > { %v403_v14 = vadd.f32 %v402_v12, %v401_v10  ;;  %v439_v15 = vrot.slane %v438_v13, 2 }
 0x10f   : > { %v404_v16 = vrot.slane %v403_v14, 1  ;;  %v440_v17 = vadd.f32 %v439_v15, %v438_v13 }
 0x111   : > { %v405_v18 = vadd.f32 %v404_v16, %v403_v14  ;;  %v441_v19 = vrot.slane %v440_v17, 1 }
 0x113   : > { %v442_v20 = vadd.f32 %v441_v19, %v440_v17  ;;  %443 = vst [vmem:[%s177_s28] sm:$0xff] %v405_v18 }
 0x115   : > { %444 = vst [vmem:[%s181_s4] sm:$0xff] %v442_v20 }
 0x116 PF: > { %s14_s12 = sadd.s32 1, %s623_s12  }
 0x117   : > { %p11_p5 = scmp.ge.s32.totalorder %s14_s12, 6  }
 0x119   :  { %13 = sbr.rel (!%p11_p5) target bundleno = 1 (0x1), region = 70 }

// kernel: basic_conv2d.3
= control target key start
LH: loop header
LB: loop body
LE: loop exit
PB: predicated region body
PF: predicated region fallthrough
CT: control target
= control target key end

     0   :  { %s757_s15 = smov 0   ;;  %s891_s0 = inlined_call_operand.vmem [shape: bf16[512,48], index: 0, kind: input, shape index: {}]   ;;  %s892_s1 = inlined_call_operand.vmem [shape: bf16[48,128], index: 1, kind: input, shape index: {}]   ;;  %s893_s2 = inlined_call_operand.vmem [shape: f32[1,128], index: 2, kind: input, shape index: {}]   ;;  %s894_s3 = inlined_call_operand.vmem [shape: f32[1,128], index: 3, kind: input, shape index: {}]   ;;  %s895_s4 = inlined_call_operand.vmem [shape: f32[512,128], index: 4, kind: output, shape index: {}]  }
   0x1 LB: > { %s602_s16 = sadd.s32 4294967295, %s730_s15   ;;  %p606_p0 = scmp.ge.s32.totalorder %s730_s15, 1  ;;  %s730_s15 = sphi %s757_s15, %s14_s15  }
   0x2   : > { %p163_p1 = scmp.lt.s32.totalorder %s730_s15, 5 }
   0x4   : > { %p164_p2 = pnand %p606_p0, %p163_p1 }
   0x5   : > { %v681_v0 = vld [vmem:[%s892_s1] sm:$0xff] (!%p164_p2)   ;;  %s607_s19 = sshll.u32 (!%p164_p2), %s602_s16, 4  ;;  %v682_v1 = vld [vmem:[%s892_s1 + $0x8] sm:$0xff] (!%p164_p2)   ;;  %v683_v2 = vld [vmem:[%s892_s1 + $0x10] sm:$0xff] (!%p164_p2)   ;;  %vm282_vm0 = vcmask (!%p164_p2), 392192  }
   0x6   : > { %167 = sbr.rel (%p164_p2) target bundleno = 268 (0x10c), region = 36  ;;  %p190_p3 = scmp.lt.s32.totalorder (!%p164_p2), %s607_s19, 63  ;;  %645 = vmatprep.subr.bf16.mxu0 (!%p164_p2), %v681_v0  ;;  %667 = vmatprep.subr.bf16.mxu1 (!%p164_p2), %v681_v0  ;;  %v791_v11 = vld [vmem:[%s893_s2] ss:$0 sm:$0xff] (!%p164_p2) }
   0x7   : > { %646 = vmatpush3.bf16.msra.mxu0 (!%p164_p2), %v681_v0  ;;  %670 = vmatpush3.bf16.msra.mxu1 (!%p164_p2), %v681_v0  ;;  %v796_v13 = vld [vmem:[%s894_s3] ss:$0 sm:$0xff] (!%p164_p2) }
   0x8   : > { %647 = vmatprep.subr.bf16.mxu0 (!%p164_p2), %v682_v1  ;;  %668 = vmatprep.subr.bf16.mxu1 (!%p164_p2), %v682_v1 }
   0xb   : > { %648 = vmatpush3.bf16.msra.mxu0 (!%p164_p2), %v682_v1  ;;  %671 = vmatpush3.bf16.msra.mxu1 (!%p164_p2), %v682_v1 }
   0xc   : > { %649 = vmatprep.subr.bf16.mxu0 (!%p164_p2), %v683_v2  ;;  %669 = vmatprep.subr.bf16.mxu1 (!%p164_p2), %v683_v2 }
   0xd   : > { %s897_s19 = smov (!%p190_p3, %s607_s19), 63 }
   0xe   : > { %s608_s24 = sshll.u32 %s897_s19, 2  ;;  %s610_s6 = sshll.u32 %s897_s19, 3 }
   0xf   : > { %s193_s27 = scalar_lea.vmem %s891_s0, %s608_s24  ;;  %650 = vmatpush3.bf16.msra.mxu0 %v683_v2  ;;  %672 = vmatpush3.bf16.msra.mxu1 %v683_v2  ;;  %s856_s9 = scalar_lea.vmem %s895_s4, %s610_s6 }
  0x10   : > { %v684_v3 = vld [vmem:[%s193_s27] sm:$0xff]   ;;  %v686_v5 = vld [vmem:[%s193_s27 + $0x8] sm:$0xff]   ;;  %v688_v7 = vld [vmem:[%s193_s27 + $0x10] sm:$0xff]  }
  0x11   : > { %v685_v4 = vld [vmem:[%s193_s27 + $0x20] sm:$0xff]   ;;  %651 = vmatprep.mubr.msk.bf16.mxu0 %vm282_vm0, %v684_v3  ;;  %v687_v6 = vld [vmem:[%s193_s27 + $0x28] sm:$0xff]   ;;  %v689_v8 = vld [vmem:[%s193_s27 + $0x30] sm:$0xff]  }
  0x12   : > { %659 = vmatprep.mubr.msk.bf16.mxu1 %vm282_vm0, %v685_v4  ;;  %652 = vmatmul.mubr.msk.bf16.vlgmr.msra.gmra.mrb[0].mxu0 %vm282_vm0, %v686_v5  ;;  %v690_v9 = vld [vmem:[%s193_s27 + $0x18] sm:$0xff]  }
  0x13   : > { %660 = vmatmul.mubr.msk.bf16.vlgmr.msra.gmra.mrb[0].mxu1 %vm282_vm0, %v687_v6  ;;  %655 = vmatprep.mubr.msk.bf16.mxu0 %vm282_vm0, %v688_v7  ;;  %v691_v10 = vld [vmem:[%s193_s27 + $0x38] sm:$0xff]  }
  0x14   : > { %663 = vmatprep.mubr.msk.bf16.mxu1 %vm282_vm0, %v689_v8 }
  0x1a   : > { %656 = vmatmul.mubr.msk.bf16.gmra.mrb[4].mxu0 %vm282_vm0, %v690_v9 }
  0x1b   : > { %664 = vmatmul.mubr.msk.bf16.gmra.mrb[4].mxu1 %vm282_vm0, %v691_v10 }
  0xe5   : > { %v653_v12 = vpop.f32.mrb[0].mxu0 }
  0xe6   : > { %v661_v14 = vpop.f32.mrb[0].mxu1  ;;  %v413_v15 = vmul.f32 %v653_v12, %v791_v11  ;;  %v341_v17 = vpop.f32.mrb[1].mxu0 }
  0xe7   : > { %v421_v16 = vmul.f32 %v661_v14, %v791_v11  ;;  %v373_v18 = vpop.f32.mrb[1].mxu1  ;;  %v411_v19 = vmul.f32 %v791_v11, %v341_v17  ;;  %v654_v21 = vpop.f32.mrb[2].mxu0 }
  0xe8   : > { %v419_v20 = vmul.f32 %v791_v11, %v373_v18  ;;  %v662_v22 = vpop.f32.mrb[2].mxu1  ;;  %v436_v23 = vadd.f32 %v796_v13, %v413_v15  ;;  %v414_v25 = vmul.f32 %v654_v21, %v791_v11  ;;  %v344_v27 = vpop.f32.mrb[3].mxu0 }
  0xe9   : > { %v444_v24 = vadd.f32 %v796_v13, %v421_v16  ;;  %v422_v26 = vmul.f32 %v662_v22, %v791_v11  ;;  %v376_v28 = vpop.f32.mrb[3].mxu1  ;;  %v434_v29 = vadd.f32 %v796_v13, %v411_v19  ;;  %v412_v31 = vmul.f32 %v791_v11, %v344_v27 }
  0xea   : > { %v442_v30 = vadd.f32 %v796_v13, %v419_v20  ;;  %v420_v32 = vmul.f32 %v791_v11, %v376_v28  ;;  %v468_v33 = vmul.f32 0.70710677, %v436_v23  ;;  %v437_v37 = vadd.f32 %v796_v13, %v414_v25 }
  0xeb   : > { %v476_v34 = vmul.f32 0.70710677, %v444_v24  ;;  %v466_v35 = vmul.f32 0.70710677, %v434_v29  ;;  %v812_v38 = vadd.f32 %v796_v13, %v422_v26  ;;  %v815_v39 = vadd.f32 %v796_v13, %v412_v31 }
  0xec   : > { %v474_v36 = vmul.f32 0.70710677, %v442_v30  ;;  %692 = verf.f32 %v468_v33  ;;  %v818_v40 = vadd.f32 %v796_v13, %v420_v32  ;;  %v469_v43 = vmul.f32 0.70710677, %v437_v37 }
  0xed   : > { %694 = verf.f32 %v476_v34  ;;  %v657_v41 = vpop.f32.mrb[4].mxu0  ;;  %v477_v46 = vmul.f32 0.70710677, %v812_v38  ;;  %v467_v47 = vmul.f32 0.70710677, %v815_v39  ;;  %v452_v2 = vmul.f32 0.5, %v436_v23 }
  0xee   : > { %v665_v42 = vpop.f32.mrb[4].mxu1  ;;  %696 = verf.f32 %v466_v35  ;;  %v357_v44 = vpop.f32.mrb[5].mxu0  ;;  %v475_v49 = vmul.f32 0.70710677, %v818_v40  ;;  %v417_v50 = vmul.f32 %v657_v41, %v791_v11  ;;  %v460_v3 = vmul.f32 0.5, %v444_v24 }
  0xef   : > { %v389_v45 = vpop.f32.mrb[5].mxu1  ;;  %698 = verf.f32 %v474_v36  ;;  %v658_v48 = vpop.f32.mrb[6].mxu0  ;;  %v425_v53 = vmul.f32 %v665_v42, %v791_v11  ;;  %v415_v54 = vmul.f32 %v791_v11, %v357_v44  ;;  %v450_v7 = vmul.f32 0.5, %v434_v29 }
  0xf0   : > { %700 = verf.f32 %v469_v43  ;;  %v666_v51 = vpop.f32.mrb[6].mxu1  ;;  %v360_v52 = vpop.f32.mrb[7].mxu0  ;;  %v423_v55 = vmul.f32 %v791_v11, %v389_v45  ;;  %v828_v57 = vadd.f32 %v796_v13, %v417_v50  ;;  %v418_v58 = vmul.f32 %v658_v48, %v791_v11 }
  0xf1   : > { %702 = verf.f32 %v477_v46  ;;  %v392_v56 = vpop.f32.mrb[7].mxu1  ;;  %v426_v59 = vmul.f32 %v666_v51, %v791_v11  ;;  %v833_v60 = vadd.f32 %v796_v13, %v425_v53  ;;  %v836_v61 = vadd.f32 %v796_v13, %v415_v54 }
  0xf2   : > { %704 = verf.f32 %v467_v47  ;;  %v839_v62 = vadd.f32 %v796_v13, %v423_v55  ;;  %v472_v63 = vmul.f32 0.70710677, %v828_v57  ;;  %v844_v0 = vadd.f32 %v796_v13, %v418_v58 }
  0xf3   : > { %706 = verf.f32 %v475_v49  ;;  %v847_v1 = vadd.f32 %v796_v13, %v426_v59  ;;  %v480_v4 = vmul.f32 0.70710677, %v833_v60  ;;  %v470_v5 = vmul.f32 0.70710677, %v836_v61 }
  0xf4   : > { %v458_v8 = vmul.f32 0.5, %v442_v30  ;;  %708 = verf.f32 %v472_v63  ;;  %v478_v9 = vmul.f32 0.70710677, %v839_v62  ;;  %v453_v14 = vmul.f32 0.5, %v437_v37 }
  0xf5   : > { %710 = verf.f32 %v480_v4  ;;  %v473_v15 = vmul.f32 0.70710677, %v844_v0  ;;  %v481_v18 = vmul.f32 0.70710677, %v847_v1  ;;  %v416_v19 = vmul.f32 %v791_v11, %v360_v52 }
  0xf6   : > { %v693_v6 = vpop.eup %692  ;;  %712 = verf.f32 %v470_v5  ;;  %v424_v23 = vmul.f32 %v791_v11, %v392_v56  ;;  %v461_v11 = vmul.f32 0.5, %v812_v38  ;;  %v451_v41 = vmul.f32 0.5, %v815_v39 }
  0xf7   : > { %v695_v10 = vpop.eup %694  ;;  %v500_v12 = vadd.f32 1.0, %v693_v6  ;;  %714 = verf.f32 %v478_v9  ;;  %v439_v27 = vadd.f32 %v796_v13, %v416_v19  ;;  %v459_v44 = vmul.f32 0.5, %v818_v40 }
  0xf8   : > { %v697_v16 = vpop.eup %696  ;;  %v508_v17 = vadd.f32 1.0, %v695_v10  ;;  %716 = verf.f32 %v473_v15  ;;  %v447_v31 = vadd.f32 %v796_v13, %v424_v23  ;;  %v456_v39 = vmul.f32 0.5, %v828_v57 }
  0xf9   : > { %v699_v20 = vpop.eup %698  ;;  %v516_v21 = vmul.f32 %v500_v12, %v452_v2  ;;  %v498_v22 = vadd.f32 1.0, %v697_v16  ;;  %718 = verf.f32 %v481_v18  ;;  %v471_v35 = vmul.f32 0.70710677, %v439_v27 }
  0xfa   : > { %v701_v24 = vpop.eup %700  ;;  %v524_v25 = vmul.f32 %v508_v17, %v460_v3  ;;  %v506_v26 = vadd.f32 1.0, %v699_v20  ;;  %v479_v43 = vmul.f32 0.70710677, %v447_v31  ;;  %v464_v51 = vmul.f32 0.5, %v833_v60 }
  0xfb   : > { %v703_v28 = vpop.eup %702  ;;  %532 = vst [vmem:[%s856_s9 + $0x10] sm:$0xff] %v516_v21  ;;  %v514_v29 = vmul.f32 %v498_v22, %v450_v7  ;;  %v501_v30 = vadd.f32 1.0, %v701_v24  ;;  %720 = verf.f32 %v471_v35  ;;  %v454_v54 = vmul.f32 0.5, %v836_v61 }
  0xfc   : > { %v705_v32 = vpop.eup %704  ;;  %540 = vst [vmem:[%s856_s9 + $0x50] sm:$0xff] %v524_v25  ;;  %v522_v33 = vmul.f32 %v506_v26, %v458_v8  ;;  %v509_v34 = vadd.f32 1.0, %v703_v28  ;;  %722 = verf.f32 %v479_v43  ;;  %v462_v59 = vmul.f32 0.5, %v839_v62 }
  0xfd   : > { %v707_v36 = vpop.eup %706  ;;  %530 = vst [vmem:[%s856_s9] sm:$0xff] %v514_v29  ;;  %v517_v37 = vmul.f32 %v501_v30, %v453_v14  ;;  %v499_v42 = vadd.f32 1.0, %v705_v32  ;;  %v457_v60 = vmul.f32 0.5, %v844_v0  ;;  %v465_v5 = vmul.f32 0.5, %v847_v1 }
  0xfe   : > { %538 = vst [vmem:[%s856_s9 + $0x40] sm:$0xff] %v522_v33  ;;  %v525_v13 = vmul.f32 %v509_v34, %v461_v11  ;;  %v507_v45 = vadd.f32 1.0, %v707_v36  ;;  %v709_v46 = vpop.eup %708  ;;  %v455_v9 = vmul.f32 0.5, %v439_v27  ;;  %v463_v12 = vmul.f32 0.5, %v447_v31 }
  0xff   : > { %533 = vst [vmem:[%s856_s9 + $0x18] sm:$0xff] %v517_v37  ;;  %v515_v38 = vmul.f32 %v499_v42, %v451_v41  ;;  %v711_v48 = vpop.eup %710  ;;  %v504_v49 = vadd.f32 1.0, %v709_v46 }
 0x100   : > { %541 = vst [vmem:[%s856_s9 + $0x58] sm:$0xff] %v525_v13  ;;  %v523_v47 = vmul.f32 %v507_v45, %v459_v44  ;;  %v713_v50 = vpop.eup %712  ;;  %v512_v40 = vadd.f32 1.0, %v711_v48 }
 0x101   : > { %531 = vst [vmem:[%s856_s9 + $0x8] sm:$0xff] %v515_v38  ;;  %v715_v52 = vpop.eup %714  ;;  %v520_v53 = vmul.f32 %v504_v49, %v456_v39  ;;  %v502_v55 = vadd.f32 1.0, %v713_v50 }
 0x102   : > { %539 = vst [vmem:[%s856_s9 + $0x48] sm:$0xff] %v523_v47  ;;  %v717_v56 = vpop.eup %716  ;;  %v528_v58 = vmul.f32 %v512_v40, %v464_v51  ;;  %v510_v63 = vadd.f32 1.0, %v715_v52 }
 0x103   : > { %v719_v57 = vpop.eup %718  ;;  %536 = vst [vmem:[%s856_s9 + $0x30] sm:$0xff] %v520_v53  ;;  %v518_v2 = vmul.f32 %v502_v55, %v454_v54  ;;  %v505_v3 = vadd.f32 1.0, %v717_v56 }
 0x104   : > { %544 = vst [vmem:[%s856_s9 + $0x70] sm:$0xff] %v528_v58  ;;  %v526_v4 = vmul.f32 %v510_v63, %v462_v59  ;;  %v513_v61 = vadd.f32 1.0, %v719_v57 }
 0x105   : > { %534 = vst [vmem:[%s856_s9 + $0x20] sm:$0xff] %v518_v2  ;;  %v521_v6 = vmul.f32 %v505_v3, %v457_v60  ;;  %v721_v7 = vpop.eup %720 }
 0x106   : > { %542 = vst [vmem:[%s856_s9 + $0x60] sm:$0xff] %v526_v4  ;;  %v529_v62 = vmul.f32 %v513_v61, %v465_v5  ;;  %v723_v8 = vpop.eup %722  ;;  %v503_v10 = vadd.f32 1.0, %v721_v7 }
 0x107   : > { %537 = vst [vmem:[%s856_s9 + $0x38] sm:$0xff] %v521_v6  ;;  %v511_v0 = vadd.f32 1.0, %v723_v8 }
 0x108   : > { %545 = vst [vmem:[%s856_s9 + $0x78] sm:$0xff] %v529_v62  ;;  %v519_v14 = vmul.f32 %v503_v10, %v455_v9 }
 0x109   : > { %v527_v15 = vmul.f32 %v511_v0, %v463_v12 }
 0x10a   : > { %535 = vst [vmem:[%s856_s9 + $0x28] sm:$0xff] %v519_v14 }
 0x10b   : > { %543 = vst [vmem:[%s856_s9 + $0x68] sm:$0xff] %v527_v15 }
 0x10c PF: > { %s14_s15 = sadd.s32 1, %s730_s15  }
 0x10d   : > { %p11_p4 = scmp.ge.s32.totalorder %s14_s15, 6  }
 0x10f   :  { %13 = sbr.rel (!%p11_p4) target bundleno = 1 (0x1), region = 66 }

</bundles_post_ra>
